<compile_context>
chip_gen: v7x
topology: tpu7x:2x2x1
jax: 0.10.0
libtpu: 0.0.40
codegen_flags: <defaults>
</compile_context>

<pallas_src>
import jax
import jax.numpy as jnp
from jax.experimental import pallas as pl
from jax.experimental.pallas import tpu as pltpu


def convt1x1_relu_kernel(x_ref, w_ref, o_ref):
    # x_ref: (C, N*L)   input, channels on sublanes, batch*length on lanes
    # w_ref: (C, 1)     weight column (ConvTranspose1d weight[:, 0, 0])
    # o_ref: (1, N*L)   output row
    x = x_ref[...]                                   # (C, NL)
    w = w_ref[...]                                   # (C, 1), broadcasts over lanes
    # VALU multiply + sublane reduce — no MXU for the O=1 case. Force f32
    # accumulation so a bf16 input does not accumulate in bf16.
    prod = (x * w).astype(jnp.float32)               # (C, NL) f32
    y = jnp.sum(prod, axis=0, keepdims=True)         # (1, NL) f32
    o_ref[...] = jnp.maximum(y, 0.0).astype(o_ref.dtype)   # fused ReLU


def convtranspose1d_relu(x, weight):
    """x: (N, C, L); weight: (C, O, 1) — PyTorch ConvTranspose1d layout.

    Only implements the module's hyperparameters: kernel_size=1, stride=1,
    out_channels=1, bias=False.
    """
    N, C, L = x.shape
    Cw, O, K = weight.shape
    assert Cw == C and K == 1 and O == 1, "kernel specialized to ConvTranspose1d(C, 1, 1)"
    NL = N * L

    # Fold batch+length into the lane dimension. For the literal N=1 case this
    # is a pure reshape (no transpose copy on the host side).
    if N == 1:
        x2d = x.reshape(C, L)
    else:
        # TODO(synk): for large N fold the batch axis via a grid/Squeezed
        # BlockSpec so the relayout happens inside the pipelined DMA instead of
        # as a separate un-hidden XLA copy.
        x2d = jnp.transpose(x, (1, 0, 2)).reshape(C, NL)
    w2d = weight[:, :, 0]                            # (C, 1)

    itemsize = jnp.dtype(x.dtype).itemsize
    cost = pl.CostEstimate(
        flops=2 * C * NL,
        bytes_accessed=(C * NL + C + NL) * itemsize,
        transcendentals=0,
    )

    out2d = pl.pallas_call(
        convt1x1_relu_kernel,
        out_shape=jax.ShapeDtypeStruct((O, NL), x.dtype),
        # Grid-less call: whole arrays resident in VMEM, single kernel invocation.
        in_specs=[
            pl.BlockSpec(memory_space=pltpu.MemorySpace.VMEM),
            pl.BlockSpec(memory_space=pltpu.MemorySpace.VMEM),
        ],
        out_specs=pl.BlockSpec(memory_space=pltpu.MemorySpace.VMEM),
        cost_estimate=cost,
    )(x2d, w2d)

    # (O, N*L) -> (N, O, L)
    if N == 1:
        return out2d.reshape(1, O, L)
    return jnp.transpose(out2d.reshape(O, N, L), (1, 0, 2))


if __name__ == "__main__":
    key = jax.random.PRNGKey(0)
    kx, kw = jax.random.split(key)

    # Shapes from the module: x1 = randn(1, 20, 32); ConvTranspose1d(20, 1, 1, bias=False)
    N, C_in, L = 1, 20, 32
    C_out = 1

    x = jax.random.normal(kx, (N, C_in, L), dtype=jnp.float32)
    # ConvTranspose1d weight shape: (in_channels, out_channels, kernel_size)
    weight = jax.random.normal(kw, (C_in, C_out, 1), dtype=jnp.float32) * 0.1

    out = convtranspose1d_relu(x, weight)
    out = jax.block_until_ready(out)

    # Reference check in plain JAX (same math as the PyTorch forward).
    ref = jnp.maximum(jnp.einsum("ncl,cok->nol", x, weight), 0.0)
    assert out.shape == (N, C_out, L), out.shape
    assert jnp.allclose(out, ref, atol=1e-5, rtol=1e-5), "mismatch vs reference"

    print("KERNEL_OK")
</pallas_src>

<mosaic_0001>
module attributes {stable_mosaic.version = 11 : i64} {
  func.func @convt1x1_relu_kernel(%arg0: memref<20x32xf32, #tpu.memory_space<vmem>>, %arg1: memref<20x1xf32, #tpu.memory_space<vmem>>, %arg2: memref<1x32xf32, #tpu.memory_space<vmem>>) attributes {dimension_semantics = [], scalar_prefetch = 0 : i64, scratch_operands = 0 : i64, tpu.core_type = #tpu.core_type<tc>} {
    %c0 = arith.constant 0 : index
    %c0_0 = arith.constant 0 : index
    %0 = vector.load %arg0[%c0, %c0_0] : memref<20x32xf32, #tpu.memory_space<vmem>>, vector<20x32xf32>
    %c0_1 = arith.constant 0 : index
    %c0_2 = arith.constant 0 : index
    %1 = vector.load %arg1[%c0_1, %c0_2] : memref<20x1xf32, #tpu.memory_space<vmem>>, vector<20x1xf32>
    %2 = vector.broadcast %1 : vector<20x1xf32> to vector<20x32xf32>
    %3 = arith.mulf %0, %2 : vector<20x32xf32>
    %cst = arith.constant dense<0.000000e+00> : vector<32xf32>
    %4 = vector.multi_reduction <add>, %3, %cst [0] : vector<20x32xf32> to vector<32xf32>
    %5 = vector.shape_cast %4 : vector<32xf32> to vector<1x32xf32>
    %cst_3 = arith.constant 0.000000e+00 : f32
    %6 = vector.broadcast %cst_3 : f32 to vector<1x32xf32>
    %7 = arith.maximumf %5, %6 : vector<1x32xf32>
    %c0_4 = arith.constant 0 : index
    %c0_5 = arith.constant 0 : index
    %8 = vector.load %arg2[%c0_4, %c0_5] : memref<1x32xf32, #tpu.memory_space<vmem>>, vector<1x32xf32>
    tpu.vector_store %arg2[%c0_4, %c0_5], %7 {strides = array<i32>} : memref<1x32xf32, #tpu.memory_space<vmem>>, vector<1x32xf32>,
    return
  }
}

</mosaic_0001>

<bundles_post_ra>
// kernel: tpu_custom_call.1
= control target key start
LH: loop header
LB: loop body
LE: loop exit
PB: predicated region body
PF: predicated region fallthrough
CT: control target
= control target key end

     0   :  { %v94_v2 = vmov 0   ;;  %s141_s0 = inlined_call_operand.vmem [shape: f32[20,32], index: 0, kind: input, shape index: {}]   ;;  %s142_s1 = inlined_call_operand.vmem [shape: f32[20,1], index: 1, kind: input, shape index: {}]   ;;  %s143_s2 = inlined_call_operand.hbm [shape: f32[1,32], index: 2, kind: output, shape index: {}]  }
   0x1   :  { %v15_v0 = vld [vmem:[%s142_s1] sm:$0xff]  ;;  %v17_v1 = vld [vmem:[%s142_s1 + $0x10] sm:$0xf]  ;;  %68 = vset.pattern.permute.xlu0 %v94_v2  ;;  %69 = vset.pattern.permute.xlu1 %v94_v2 }
   0x2   :  { %7 = vsyncpa [#allocation3], 0  ;;  %20 = vperm.xlu0 %68, %v15_v0   ;;  %30 = vperm.xlu1 %69, %v17_v1   ;;  %v16_v3 = vld [vmem:[%s142_s1 + $0x8] sm:$0xff]  ;;  %v12_v5 = vld [vmem:[%s141_s0] sm:$0xff]  ;;  %vm36_vm0 = vcmask 261120   ;;  %vm40_vm1 = vcmask 257024  }
   0x3   :  { %v14_v7 = vld [vmem:[%s141_s0 + $0x10] sm:$0xf]  ;;  %v13_v8 = vld [vmem:[%s141_s0 + $0x8] sm:$0xff]  ;;  %s95_s1 = smov [#allocation2]   ;;  %vm50_vm2 = vcmask 253952  }
   0x4   :  { %s58_s21 = sshll.u32 %s95_s1, 4  ;;  %s59_s21 = int_to_ptr.vmem [resolvable:$true] %s58_s21 }
   0x5   :  { %s70_s0 = scalar_lea.vmem %s59_s21, 16  ;;  %s74_s22 = scalar_lea.vmem %s59_s21, 32 }
   0x6   :  { %25 = vperm.xlu0 %68, %v16_v3   ;;  %p71_p0 = scmp.ne.s32.totalorder %s59_s21, %s70_s0  ;;  %p75_p1 = scmp.lt.s32.totalorder %s59_s21, %s59_s21 }
   0x7   :  { %p76_p2 = scmp.lt.s32.totalorder %s74_s22, %s70_s0 }
   0x9   :  { %p77_p3 = por %p76_p2, %p75_p1 }
   0xb   :  { %p78_p4 = pnand %p77_p3, %p71_p0 }
  0x81   :  { %v21_v4 = vpop.permute.xlu0 %20  ;;  %v31_v6 = vpop.permute.xlu1 %30 }
  0x82   :  { %v33_v9 = vmul.f32 %v21_v4, %v12_v5  ;;  %v35_v10 = vmul.f32 %v31_v6, %v14_v7 }
  0x84   :  { %v37_v13 = vsel %vm36_vm0, %v33_v9, 0.0  ;;  %v41_v15 = vsel %vm40_vm1, %v35_v10, 0.0 }
  0x85   :  { %v26_v11 = vpop.permute.xlu0 %25 }
  0x86   :  { %v34_v12 = vmul.f32 %v26_v11, %v13_v8 }
  0x88   :  { %v38_v14 = vsel %vm36_vm0, %v34_v12, 0.0 }
  0x89   :  { %v39_v16 = vadd.f32 %v38_v14, %v37_v13 }
  0x8b   :  { %v42_v17 = vadd.f32 %v41_v15, %v39_v16 }
  0x8d   :  { %v43_v18 = vrot.slane %v42_v17, 4 }
  0x8f   :  { %v44_v19 = vadd.f32 %v43_v18, %v42_v17 }
  0x91   :  { %v45_v20 = vrot.slane %v44_v19, 2 }
  0x93   :  { %v46_v21 = vadd.f32 %v45_v20, %v44_v19 }
  0x95   :  { %v47_v22 = vrot.slane %v46_v21, 1 }
  0x97   :  { %v48_v23 = vadd.f32 %v47_v22, %v46_v21 }
  0x99   :  { %v49_v24 = vmax.f32 %v48_v23, 0.0 }
  0x9b   :  { %51 = vst.msk [vmem:[#allocation2] sm:$0x1] %vm50_vm2, %v49_v24 }
  0x9c   :  { %81 = shalt.err (!%p78_p4)
}
  0x9d   :  { %s82_s25 = scalar_lea.hbm %s143_s2, 16 }
  0x9e   :  { %p83_p5 = scmp.ne.s32.totalorder %s143_s2, %s82_s25  ;;  %p86_p6 = scmp.lt.u32.totalorder %s82_s25, %s143_s2 }
  0xa0   :  { %p88_p7 = pnand %p86_p6, %p83_p5 }
  0xa2   :  { %91 = shalt.err (!%p88_p7)
}
  0xa3   :  { %61 = dma.vmem_to_hbm [thread:$0]  %s59_s21, 16, %s143_s2, [#allocation3]  }
  0xa4   :  { %92 = dma.done.wait [#allocation3], 16  }
  0xa5   :  { %93 = vsyncadd [#allocation3], 4294967280 }
  0xa6   :  { %65 = vsyncpa [#allocation3], 1 }

</bundles_post_ra>
